<compile_context>
chip_gen: v7x
topology: tpu7x:2x2x1
jax: 0.10.0
libtpu: 0.0.40
codegen_flags: <defaults>
</compile_context>

<pallas_src>
import jax
import jax.numpy as jnp
from jax.experimental import pallas as pl
from jax.experimental.pallas import tpu as pltpu


def _round_up(x, n):
    return ((x + n - 1) // n) * n


# --------------------------------------------------------------------------- #
# Kernel body
# --------------------------------------------------------------------------- #
def _ffn_kernel(x_ref, wgw1_ref, w2_ref, o_ref, acc_ref):
    # x_ref   : (tm, E)      resident across k (index_map ignores k), already in
    #                        the weights' dtype (cast hoisted to the wrapper).
    # wgw1_ref: (E, 2*tf)    [wg block k | w1 block k], streamed along k.
    # w2_ref  : (tf, E)      streamed along k.
    # o_ref   : (tm, E)
    # acc_ref : (tm, E) f32  VMEM scratch, persists across the k axis.
    k = pl.program_id(1)
    tf = w2_ref.shape[0]

    @pl.when(k == 0)
    def _():
        acc_ref[...] = jnp.zeros_like(acc_ref)

    # Fused gate+up projection: one weight stream, one wide MXU matmul, f32 acc.
    gh = jnp.dot(x_ref[...], wgw1_ref[...], preferred_element_type=jnp.float32)
    g = gh[:, :tf]
    h = gh[:, tf:]
    # SiLU(g) * h in f32 (sigmoid uses the EUP slot -> effectively free).
    gated = (g * jax.nn.sigmoid(g)) * h
    # Down projection, accumulated across the ff reduction axis.
    acc_ref[...] += jnp.dot(gated.astype(w2_ref.dtype), w2_ref[...],
                            preferred_element_type=jnp.float32)

    @pl.when(k == pl.num_programs(1) - 1)
    def _():
        o_ref[...] = acc_ref[...].astype(o_ref.dtype)


# --------------------------------------------------------------------------- #
# Generation detection & tiling
# --------------------------------------------------------------------------- #
def _tpu_generation():
    """Return (vmem_capacity_bytes, gen) with gen in {'v5', 'v6', 'v7'}."""
    cap = 128 << 20
    try:
        info = pltpu.get_tpu_info()
        cap = int(getattr(info, "vmem_capacity_bytes", cap))
    except Exception:
        pass
    kind = ""
    try:
        kind = jax.devices()[0].device_kind.lower()
    except Exception:
        pass
    if "v7" in kind or cap <= (64 << 20):
        return cap, "v7"
    if "v5" in kind:
        return cap, "v5"
    return cap, "v6"   # v6e and unknown 128-MiB-class parts


def _weight_spec(block_shape, index_map, nbuf):
    """Weight BlockSpec, optionally with deeper pipelining for decode."""
    if nbuf > 2:
        try:
            return pl.BlockSpec(block_shape, index_map,
                                pipeline_mode=pl.Buffered(nbuf))
        except TypeError:  # older API without pipeline_mode: fall back cleanly
            pass
    return pl.BlockSpec(block_shape, index_map)


# --------------------------------------------------------------------------- #
# Wrapper
# --------------------------------------------------------------------------- #
def llama_feed_forward(x, wg, w1, w2, *, tm=None, tf=None, vmem_limit_bytes=None):
    """x: [..., emb_dim]; wg/w1: [emb_dim, ff_dim]; w2: [ff_dim, emb_dim]."""
    orig_shape = x.shape
    emb_dim = orig_shape[-1]
    ff_dim = wg.shape[1]
    out_dtype = x.dtype
    w_dtype = wg.dtype
    w_item = jnp.dtype(w_dtype).itemsize
    out_item = jnp.dtype(out_dtype).itemsize

    # Flatten leading dims; hoist the activation cast out of the k loop: the MXU
    # runs in the weights' dtype, so cast once here (not tm*E VPU work per step).
    x2d = x.reshape(-1, emb_dim)
    if x2d.dtype != w_dtype:
        x2d = x2d.astype(w_dtype)
    x_item = jnp.dtype(x2d.dtype).itemsize
    m = x2d.shape[0]

    # ---- per-generation tile / VMEM preferences ---------------------------- #
    cap, gen = _tpu_generation()
    if gen == "v7":
        # 64 MiB/TensorCore: smaller tiles, leave headroom for Mosaic scratch.
        auto_vlim = max(32 << 20, min(cap - (8 << 20), 56 << 20))
        tm_pref, tf_pref, tf_decode = 512, 256, 1024
    elif gen == "v5":
        # Ridge ~240 FLOP/byte: tm=256 is already compute-bound; spend VMEM on tf
        # instead (fewer grid steps / DMA descriptors).
        auto_vlim = min(cap * 3 // 4, 96 << 20)
        tm_pref, tf_pref, tf_decode = 256, 1024, 2048
    else:  # v6e
        # Ridge ~650 FLOP/byte: need tm ~1024 to keep the MXU fed on large M.
        auto_vlim = min(cap * 3 // 4, 96 << 20)
        tm_pref, tf_pref, tf_decode = 1024, 512, 2048

    if vmem_limit_bytes is None:
        vmem_limit_bytes = auto_vlim
    if tm is None:
        tm = tm_pref

    # ---- token tile -------------------------------------------------------- #
    tm = max(16, _round_up(min(tm, _round_up(m, 16)), 16))
    decode = _round_up(m, 16) <= tm            # single token tile -> pure streaming
    if tf is None:
        tf = tf_decode if decode else tf_pref

    # ---- ff tile (lane-aligned) -------------------------------------------- #
    tf = min(tf, ff_dim)
    if tf < ff_dim:
        tf = min(_round_up(tf, 128), ff_dim)

    # ---- VMEM-fit model (incl. Mosaic f32 intermediates + accumulator) ----- #
    budget = int(vmem_limit_bytes * 0.9)

    def _fits(tm_, tf_, nbuf_w):
        x_tile = 2 * tm_ * emb_dim * x_item                 # double-buffered x
        w_tile = nbuf_w * 3 * tf_ * emb_dim * w_item        # (E,2tf) + (tf,E)
        o_tile = 2 * tm_ * emb_dim * out_item               # double-buffered out
        acc = tm_ * emb_dim * 4                             # f32 accumulator
        inter = 4 * tm_ * tf_ * 4                           # gh + gated + slack
        return x_tile + w_tile + o_tile + acc + inter <= budget

    # Shrink tf first (preserves arithmetic intensity == tm), then tm.
    while not _fits(tm, tf, 2) and tf > 128:
        new_tf = max(128, ((tf // 2) // 128) * 128)
        tf = min(new_tf, ff_dim)
        if tf < ff_dim and tf % 128 != 0:
            tf = ff_dim
            break
    while not _fits(tm, tf, 2) and tm > 16:
        tm = max(16, _round_up(tm // 2, 16))

    # ---- padding ------------------------------------------------------------ #
    m_pad = _round_up(m, tm)
    if m_pad != m:
        x2d = jnp.pad(x2d, ((0, m_pad - m), (0, 0)))

    ff_pad = _round_up(ff_dim, tf)
    kt = ff_pad // tf
    if ff_pad != ff_dim:
        # Padded gate/up columns give silu(0)*0 == 0; padded w2 rows add nothing.
        wg = jnp.pad(wg, ((0, 0), (0, ff_pad - ff_dim)))
        w1 = jnp.pad(w1, ((0, 0), (0, ff_pad - ff_dim)))
        w2 = jnp.pad(w2, ((0, ff_pad - ff_dim), (0, 0)))

    # Merge gate & up weights so block k of the last axis is
    #   [ wg[:, k*tf:(k+1)*tf] | w1[:, k*tf:(k+1)*tf] ]  -> one DMA stream / step.
    wgw1 = jnp.concatenate(
        [wg.reshape(emb_dim, kt, tf), w1.reshape(emb_dim, kt, tf)], axis=-1
    ).reshape(emb_dim, kt * 2 * tf)

    n_tok_tiles = m_pad // tm
    # Deeper weight buffering only pays off in the long, decode-style k loop.
    nbuf_w = 3 if (decode and kt > 8 and _fits(tm, tf, 3)) else 2

    # ---- cost estimate: weights are re-streamed once per token tile ---------- #
    w_bytes = (wgw1.size + w2.size) * w_item
    cost = pl.CostEstimate(
        flops=6 * m_pad * emb_dim * ff_pad,          # 3 matmuls of 2*m*E*F
        transcendentals=m_pad * ff_pad,              # sigmoid
        bytes_accessed=(x2d.size * x_item
                        + n_tok_tiles * w_bytes
                        + m_pad * emb_dim * out_item),
    )

    out = pl.pallas_call(
        _ffn_kernel,
        out_shape=jax.ShapeDtypeStruct((m_pad, emb_dim), out_dtype),
        grid_spec=pltpu.PrefetchScalarGridSpec(
            num_scalar_prefetch=0,
            grid=(n_tok_tiles, kt),
            in_specs=[
                pl.BlockSpec((tm, emb_dim), lambda i, k: (i, 0)),            # x
                _weight_spec((emb_dim, 2 * tf), lambda i, k: (0, k), nbuf_w),  # wg|w1
                _weight_spec((tf, emb_dim), lambda i, k: (k, 0), nbuf_w),      # w2
            ],
            out_specs=pl.BlockSpec((tm, emb_dim), lambda i, k: (i, 0)),
            scratch_shapes=[pltpu.VMEM((tm, emb_dim), jnp.float32)],
        ),
        compiler_params=pltpu.CompilerParams(
            dimension_semantics=("parallel", "arbitrary"),
            vmem_limit_bytes=int(vmem_limit_bytes),
        ),
        cost_estimate=cost,
    )(x2d, wgw1, w2)

    if m_pad != m:
        out = out[:m]
    return out.reshape(orig_shape)


# --------------------------------------------------------------------------- #
# Synthetic params + self-test
# --------------------------------------------------------------------------- #
def init_params(key, emb_dim, ff_dim, dtype=jnp.float32):
    """Deterministic synthetic weights (uniform, torch-Linear-like scale)."""
    kg, k1, k2 = jax.random.split(key, 3)
    bound_in = 1.0 / (emb_dim ** 0.5)
    bound_ff = 1.0 / (ff_dim ** 0.5)
    # stored already transposed vs. torch (see layout comment above)
    wg = jax.random.uniform(kg, (emb_dim, ff_dim), dtype, -bound_in, bound_in)
    w1 = jax.random.uniform(k1, (emb_dim, ff_dim), dtype, -bound_in, bound_in)
    w2 = jax.random.uniform(k2, (ff_dim, emb_dim), dtype, -bound_ff, bound_ff)
    return wg, w1, w2


def _reference(x, wg, w1, w2):
    g = x @ wg
    return (jax.nn.silu(g) * (x @ w1)) @ w2


if __name__ == "__main__":
    key = jax.random.PRNGKey(0)

    # Case 1: nicely shaped small problem.
    batch, seq, emb_dim, ff_dim = 2, 8, 32, 64
    kx, kp, kx2, kp2 = jax.random.split(key, 4)
    x = jax.random.normal(kx, (batch, seq, emb_dim), jnp.float32)
    wg, w1, w2 = init_params(kp, emb_dim, ff_dim, dtype=jnp.float32)
    out = jax.block_until_ready(llama_feed_forward(x, wg, w1, w2))
    ref = _reference(x, wg, w1, w2)
    assert out.shape == (batch, seq, emb_dim)
    assert jnp.allclose(out, ref, atol=1e-4, rtol=1e-4), (
        float(jnp.max(jnp.abs(out - ref))))

    # Case 2: awkward shapes to exercise token padding.
    batch2, seq2, emb2, ff2 = 2, 5, 32, 80
    x2 = jax.random.normal(kx2, (batch2, seq2, emb2), jnp.float32)
    wg2, w12, w22 = init_params(kp2, emb2, ff2, dtype=jnp.float32)
    out2 = jax.block_until_ready(llama_feed_forward(x2, wg2, w12, w22))
    ref2 = _reference(x2, wg2, w12, w22)
    assert out2.shape == (batch2, seq2, emb2)
    assert jnp.allclose(out2, ref2, atol=1e-4, rtol=1e-4), (
        float(jnp.max(jnp.abs(out2 - ref2))))

    print("KERNEL_OK")
</pallas_src>

<mosaic_0001>
module attributes {stable_mosaic.version = 11 : i64} {
  func.func @_ffn_kernel(%arg0: i32, %arg1: i32, %arg2: memref<16x32xf32, #tpu.memory_space<vmem>>, %arg3: memref<32x128xf32, #tpu.memory_space<vmem>>, %arg4: memref<64x32xf32, #tpu.memory_space<vmem>>, %arg5: memref<16x32xf32, #tpu.memory_space<vmem>>, %arg6: memref<16x32xf32, #tpu.memory_space<vmem>>) attributes {dimension_semantics = [#tpu.dimension_semantics<parallel>, #tpu.dimension_semantics<arbitrary>], iteration_bounds = array<i64: 1, 1>, scalar_prefetch = 0 : i64, scratch_operands = 1 : i64, tpu.core_type = #tpu.core_type<tc>, window_params = [{transform_indices = @transform_0, window_bounds = array<i64: 16, 32>}, {transform_indices = @transform_1, window_bounds = array<i64: 32, 128>}, {transform_indices = @transform_2, window_bounds = array<i64: 64, 32>}, {transform_indices = @transform_3, window_bounds = array<i64: 16, 32>}]} {
    %c0_i32 = arith.constant 0 : i32
    %0 = arith.cmpi eq, %arg1, %c0_i32 : i32
    %1 = arith.extui %0 : i1 to i32
    %c0_i32_0 = arith.constant 0 : i32
    %2 = arith.cmpi ne, %1, %c0_i32_0 : i32
    scf.if %2 {
      %cst_14 = arith.constant 0.000000e+00 : f32
      %23 = vector.broadcast %cst_14 : f32 to vector<16x32xf32>
      %c0_15 = arith.constant 0 : index
      %c0_16 = arith.constant 0 : index
      %24 = vector.load %arg6[%c0_15, %c0_16] : memref<16x32xf32, #tpu.memory_space<vmem>>, vector<16x32xf32>
      tpu.vector_store %arg6[%c0_15, %c0_16], %23 {strides = array<i32>} : memref<16x32xf32, #tpu.memory_space<vmem>>, vector<16x32xf32>,
    } else {
    }
    %c0 = arith.constant 0 : index
    %c0_1 = arith.constant 0 : index
    %3 = vector.load %arg2[%c0, %c0_1] : memref<16x32xf32, #tpu.memory_space<vmem>>, vector<16x32xf32>
    %c0_2 = arith.constant 0 : index
    %c0_3 = arith.constant 0 : index
    %4 = vector.load %arg3[%c0_2, %c0_3] : memref<32x128xf32, #tpu.memory_space<vmem>>, vector<32x128xf32>
    %cst = arith.constant dense<0.000000e+00> : vector<16x128xf32>
    %5 = tpu.matmul %3, %4, %cst {dimension_numbers = #tpu.dot_dimension_numbers<[1], [0], [0], [1], [0, 0, 1, 1], [], []>} : vector<16x32xf32>, vector<32x128xf32>, vector<16x128xf32> -> vector<16x128xf32>
    %6 = vector.extract_strided_slice %5 {offsets = [0, 0], sizes = [16, 64], strides = [1, 1]} : vector<16x128xf32> to vector<16x64xf32>
    %7 = vector.extract_strided_slice %5 {offsets = [0, 64], sizes = [16, 64], strides = [1, 1]} : vector<16x128xf32> to vector<16x64xf32>
    %8 = arith.negf %6 : vector<16x64xf32>
    %9 = math.exp %8 : vector<16x64xf32>
    %cst_4 = arith.constant 1.000000e+00 : f32
    %10 = vector.broadcast %cst_4 : f32 to vector<16x64xf32>
    %11 = arith.addf %10, %9 : vector<16x64xf32>
    %12 = arith.divf %10, %11 : vector<16x64xf32>
    %13 = arith.mulf %6, %12 : vector<16x64xf32>
    %14 = arith.mulf %13, %7 : vector<16x64xf32>
    %c0_5 = arith.constant 0 : index
    %c0_6 = arith.constant 0 : index
    %15 = vector.load %arg6[%c0_5, %c0_6] : memref<16x32xf32, #tpu.memory_space<vmem>>, vector<16x32xf32>
    %c0_7 = arith.constant 0 : index
    %c0_8 = arith.constant 0 : index
    %16 = vector.load %arg4[%c0_7, %c0_8] : memref<64x32xf32, #tpu.memory_space<vmem>>, vector<64x32xf32>
    %cst_9 = arith.constant dense<0.000000e+00> : vector<16x32xf32>
    %17 = tpu.matmul %14, %16, %cst_9 {dimension_numbers = #tpu.dot_dimension_numbers<[1], [0], [0], [1], [0, 0, 1, 1], [], []>} : vector<16x64xf32>, vector<64x32xf32>, vector<16x32xf32> -> vector<16x32xf32>
    %18 = arith.addf %15, %17 : vector<16x32xf32>
    %c0_10 = arith.constant 0 : index
    %c0_11 = arith.constant 0 : index
    %19 = vector.load %arg6[%c0_10, %c0_11] : memref<16x32xf32, #tpu.memory_space<vmem>>, vector<16x32xf32>
    tpu.vector_store %arg6[%c0_10, %c0_11], %18 {strides = array<i32>} : memref<16x32xf32, #tpu.memory_space<vmem>>, vector<16x32xf32>,
    %c0_i32_12 = arith.constant 0 : i32
    %20 = arith.cmpi eq, %arg1, %c0_i32_12 : i32
    %21 = arith.extui %20 : i1 to i32
    %c0_i32_13 = arith.constant 0 : i32
    %22 = arith.cmpi ne, %21, %c0_i32_13 : i32
    scf.if %22 {
      %c0_14 = arith.constant 0 : index
      %c0_15 = arith.constant 0 : index
      %23 = vector.load %arg6[%c0_14, %c0_15] : memref<16x32xf32, #tpu.memory_space<vmem>>, vector<16x32xf32>
      %c0_16 = arith.constant 0 : index
      %c0_17 = arith.constant 0 : index
      %24 = vector.load %arg5[%c0_16, %c0_17] : memref<16x32xf32, #tpu.memory_space<vmem>>, vector<16x32xf32>
      tpu.vector_store %arg5[%c0_16, %c0_17], %23 {strides = array<i32>} : memref<16x32xf32, #tpu.memory_space<vmem>>, vector<16x32xf32>,
    } else {
    }
    return
  }
  func.func @transform_0(%arg0: i32, %arg1: i32) -> (i32, i32) {
    %c0_i32 = arith.constant 0 : i32
    %c0_i32_0 = arith.constant 0 : i32
    return %arg0, %c0_i32 : i32, i32
  }
  func.func @transform_1(%arg0: i32, %arg1: i32) -> (i32, i32) {
    %c0_i32 = arith.constant 0 : i32
    %c0_i32_0 = arith.constant 0 : i32
    return %c0_i32, %arg1 : i32, i32
  }
  func.func @transform_2(%arg0: i32, %arg1: i32) -> (i32, i32) {
    %c0_i32 = arith.constant 0 : i32
    %c0_i32_0 = arith.constant 0 : i32
    return %arg1, %c0_i32 : i32, i32
  }
  func.func @transform_3(%arg0: i32, %arg1: i32) -> (i32, i32) {
    %c0_i32 = arith.constant 0 : i32
    %c0_i32_0 = arith.constant 0 : i32
    return %arg0, %c0_i32 : i32, i32
  }
}

</mosaic_0001>

<bundles_post_ra>
// kernel: tpu_custom_call.1
= control target key start
LH: loop header
LB: loop body
LE: loop exit
PB: predicated region body
PF: predicated region fallthrough
CT: control target
= control target key end

     0   :  { %8 = vsyncpa [#allocation4], 0  ;;  %s585_s0 = inlined_call_operand.hbm [shape: f32[16,32], index: 0, kind: input, shape index: {}]   ;;  %s586_s1 = inlined_call_operand.hbm [shape: f32[32,128], index: 1, kind: input, shape index: {}]   ;;  %s587_s2 = inlined_call_operand.hbm [shape: f32[64,32], index: 2, kind: input, shape index: {}]   ;;  %s588_s3 = inlined_call_operand.hbm [shape: f32[16,32], index: 3, kind: output, shape index: {}]  }
   0x1   :  { %9 = vsyncpa [#allocation7], 0 }
   0x2   :  { %10 = vsyncpa [#allocation5], 0  ;;  %s482_s12 = smov [#allocation6]   ;;  %s483_s14 = smov [#allocation3]  }
   0x3   :  { %s28_s13 = sshll.u32 %s482_s12, 4  ;;  %s16_s15 = sshll.u32 %s483_s14, 4  ;;  %s29_s13 = int_to_ptr.vmem [resolvable:$true] %s28_s13  ;;  %s510_s15 = int_to_ptr.vmem [resolvable:$true] %s16_s15 }
   0x4   :  { %s388_s18 = scalar_lea.hbm %s586_s1, 512 }
   0x5   :  { %p389_p0 = scmp.ne.s32.totalorder %s586_s1, %s388_s18  ;;  %p392_p1 = scmp.lt.u32.totalorder %s388_s18, %s586_s1 }
   0x7   :  { %p394_p2 = pnand %p392_p1, %p389_p0 }
   0x9   :  { %397 = shalt.err (!%p394_p2)
}
   0xa   :  { %s398_s23 = scalar_lea.vmem %s29_s13, 512  ;;  %p403_p4 = scmp.lt.s32.totalorder %s29_s13, %s29_s13 }
   0xb   :  { %p399_p3 = scmp.ne.s32.totalorder %s29_s13, %s398_s23  ;;  %p404_p5 = scmp.lt.s32.totalorder %s398_s23, %s398_s23 }
   0xd   :  { %p405_p6 = por %p404_p5, %p403_p4 }
   0xf   :  { %p406_p7 = pnand %p405_p6, %p399_p3 }
  0x11   :  { %409 = shalt.err (!%p406_p7)
}
  0x12   :  { %s484_s24 = smov 128   ;;  %s485_s25 = smov 8  }
  0x13   :  { %34 = dma.hbm_to_vmem [thread:$0]  %s586_s1, 512, %s29_s13, [#allocation7], %s484_s24, %s484_s24, %s485_s25  }
  0x14   :  { %s410_s30 = scalar_lea.hbm %s585_s0, 256 }
  0x15   :  { %p411_p8 = scmp.ne.s32.totalorder %s585_s0, %s410_s30  ;;  %p414_p9 = scmp.lt.u32.totalorder %s410_s30, %s585_s0 }
  0x17   :  { %p416_p10 = pnand %p414_p9, %p411_p8 }
  0x19   :  { %419 = shalt.err (!%p416_p10)
}
  0x1a   :  { %s420_s8 = scalar_lea.vmem %s510_s15, 256  ;;  %p425_p12 = scmp.lt.s32.totalorder %s510_s15, %s510_s15 }
  0x1b   :  { %p421_p11 = scmp.ne.s32.totalorder %s510_s15, %s420_s8  ;;  %p426_p13 = scmp.lt.s32.totalorder %s420_s8, %s420_s8 }
  0x1d   :  { %p427_p0 = por %p426_p13, %p425_p12 }
  0x1f   :  { %p428_p1 = pnand %p427_p0, %p421_p11 }
  0x21   :  { %431 = shalt.err (!%p428_p1)
}
  0x22   :  { %22 = dma.hbm_to_vmem [thread:$0]  %s585_s0, 256, %s510_s15, [#allocation4], %s484_s24, %s484_s24, %s485_s25  }
  0x23   :  { %s486_s10 = smov [#allocation8]   ;;  %s432_s14 = scalar_lea.hbm %s587_s2, 1024 }
  0x24   :  { %s40_s11 = sshll.u32 %s486_s10, 4  ;;  %p433_p2 = scmp.ne.s32.totalorder %s587_s2, %s432_s14  ;;  %s41_s11 = int_to_ptr.vmem [resolvable:$true] %s40_s11 }
  0x25   :  { %p436_p3 = scmp.lt.u32.totalorder %s432_s14, %s587_s2 }
  0x27   :  { %p438_p4 = pnand %p436_p3, %p433_p2 }
  0x29   :  { %441 = shalt.err (!%p438_p4)
}
  0x2a   :  { %s442_s20 = scalar_lea.vmem %s41_s11, 1024  ;;  %p447_p6 = scmp.lt.s32.totalorder %s41_s11, %s41_s11 }
  0x2b   :  { %p443_p5 = scmp.ne.s32.totalorder %s41_s11, %s442_s20  ;;  %p448_p7 = scmp.lt.s32.totalorder %s442_s20, %s442_s20 }
  0x2d   :  { %p449_p8 = por %p448_p7, %p447_p6 }
  0x2f   :  { %p450_p9 = pnand %p449_p8, %p443_p5 }
  0x31   :  { %453 = shalt.err (!%p450_p9)
}
  0x32   :  { %46 = dma.hbm_to_vmem [thread:$0]  %s587_s2, 1024, %s41_s11, [#allocation7], %s484_s24, %s484_s24, %s485_s25  }
  0x33   :  { %476 = dma.done.wait [#allocation4], 256  }
  0x34   :  { %477 = vsyncadd [#allocation4], 4294967040 }
  0x35   :  { %478 = dma.done.wait [#allocation7], 1536  }
  0x36   :  { %479 = vsyncadd [#allocation7], 4294965760  ;;  %vm60_vm0 = vcmask 261120   ;;  %v65_v0 = vld [vmem:[#allocation6] sm:$0xff]  ;;  %v66_v1 = vld [vmem:[#allocation6 + $0x8] sm:$0xff]  ;;  %v487_v20 = vmov 0.0  }
  0x37   :  { %v67_v2 = vld [vmem:[#allocation6 + $0x10] sm:$0xff]  ;;  %v348_v3 = vpack.c.bf16 %v66_v1, %v65_v0  ;;  %v68_v4 = vld [vmem:[#allocation6 + $0x18] sm:$0xff]  ;;  %v177_v8 = vld [vmem:[#allocation8] sm:$0xff]  ;;  %62 = vst.msk [vmem:[#allocation2 + $0x8] sm:$0xff] %vm60_vm0, %v487_v20  ;;  %s488_s2 = smov 64   ;;  %vm185_vm1 = vcmask 523264  }
  0x38   :  { %v63_v5 = vld [vmem:[#allocation3] sm:$0xff]  ;;  %v352_v6 = vpack.c.bf16 %v68_v4, %v67_v2  ;;  %v64_v7 = vld [vmem:[#allocation3 + $0x8] sm:$0xff]  ;;  %v178_v9 = vld [vmem:[#allocation8 + $0x8] sm:$0xff]  ;;  %61 = vst.msk [vmem:[#allocation2] sm:$0xff] %vm60_vm0, %v487_v20  ;;  %s489_s21 = smov [#allocation9]  }
  0x39   :  { %326 = vmatprep.mubr.msk.f32.mxu0 %vm60_vm0, %v63_v5  ;;  %349 = vmatprep.subr.bf16.mxu0 %v348_v3  ;;  %v179_v10 = vld [vmem:[#allocation8 + $0x10] sm:$0xff]  ;;  %v356_v11 = vpack.c.bf16 %v178_v9, %v177_v8  ;;  %v180_v12 = vld [vmem:[#allocation8 + $0x18] sm:$0xff]  ;;  %v181_v14 = vld [vmem:[#allocation8 + $0x20] sm:$0xff]  ;;  %s283_s22 = sshll.u32 %s489_s21, 4  ;;  %s284_s22 = int_to_ptr.vmem [resolvable:$true] %s283_s22 }
  0x3a   :  { %351 = vmatpush3.bf16.msra.mxu0 %v348_v3  ;;  %v360_v13 = vpack.c.bf16 %v180_v12, %v179_v10  ;;  %v182_v15 = vld [vmem:[#allocation8 + $0x28] sm:$0xff]  ;;  %v183_v17 = vld [vmem:[#allocation8 + $0x30] sm:$0xff]  ;;  %v184_v18 = vld [vmem:[#allocation8 + $0x38] sm:$0xff]  ;;  %s454_s23 = scalar_lea.vmem %s284_s22, 256  ;;  %p459_p11 = scmp.lt.s32.totalorder %s284_s22, %s284_s22 }
  0x3b   :  { %353 = vmatprep.subr.bf16.mxu0 %v352_v6  ;;  %357 = vmatprep.subr.bf16.mxu1 %v356_v11  ;;  %v364_v16 = vpack.c.bf16 %v182_v15, %v181_v14  ;;  %v368_v19 = vpack.c.bf16 %v184_v18, %v183_v17  ;;  %p455_p10 = scmp.ne.s32.totalorder %s284_s22, %s454_s23  ;;  %p460_p12 = scmp.lt.s32.totalorder %s454_s23, %s454_s23 }
  0x3c   :  { %359 = vmatpush3.bf16.msra.mxu1 %v356_v11 }
  0x3d   :  { %361 = vmatprep.subr.bf16.mxu1 %v360_v13  ;;  %p461_p13 = por %p460_p12, %p459_p11 }
  0x3e   :  { %355 = vmatpush3.bf16.msra.mxu0 %v352_v6  ;;  %v176_v37 = vld [vmem:[#allocation2 + $0x8] sm:$0xff] }
  0x3f   :  { %v175_v38 = vld [vmem:[#allocation2] sm:$0xff]  ;;  %p462_p0 = pnand %p461_p13, %p455_p10 }
  0x40   :  { %363 = vmatpush3.bf16.msra.mxu1 %v360_v13 }
  0x41   :  { %327 = vmatmul.mubr.msk.f32.vlgmr.msra.gmra.mrb[0].mxu0 %vm60_vm0, %v64_v7  ;;  %365 = vmatprep.subr.bf16.mxu1 %v364_v16 }
  0x44   :  { %367 = vmatpush3.bf16.msra.mxu1 %v364_v16 }
  0x45   :  { %369 = vmatprep.subr.bf16.mxu1 %v368_v19 }
  0x48   :  { %371 = vmatpush3.bf16.msra.mxu1 %v368_v19 }
 0x114   :  { %v328_v21 = vpop.f32.mrb[0].mxu0 }
 0x115   :  { %v142_v22 = vpop.f32.mrb[1].mxu0  ;;  %v299_v24 = vmul.f32 -1.442695, %v328_v21 }
 0x116   :  { %167 = vrot.lane.b32.xlu0 %v142_v22, %s488_s2  ;;  %v298_v23 = vmul.f32 -1.442695, %v142_v22 }
 0x118   :  { %380 = vpow2.f32 %v298_v23 }
 0x119   :  { %382 = vpow2.f32 %v299_v24 }
 0x11a   :  { %169 = vrot.lane.b32.xlu0 %v328_v21, %s488_s2 }
 0x122   :  { %v381_v25 = vpop.eup %380 }
 0x123   :  { %v157_v26 = vadd.f32 1.0, %v381_v25  ;;  %v383_v27 = vpop.eup %382 }
 0x124   :  { %v158_v28 = vadd.f32 1.0, %v383_v27 }
 0x125   :  { %384 = vrcp.f32 %v157_v26 }
 0x126   :  { %386 = vrcp.f32 %v158_v28 }
 0x12f   :  { %v385_v29 = vpop.eup %384 }
 0x130   :  { %v163_v30 = vmul.f32 %v385_v29, %v142_v22  ;;  %v387_v31 = vpop.eup %386 }
 0x131   :  { %v164_v34 = vmul.f32 %v387_v31, %v328_v21 }
 0x188   :  { %v168_v32 = vpop.permute.xlu0 %167 }
 0x189   :  { %v173_v33 = vmul.f32 %v168_v32, %v163_v30 }
 0x18b   :  { %345 = vmatprep.mubr.msk.f32.mxu1 %vm185_vm1, %v173_v33 }
 0x18c   :  { %v170_v35 = vpop.permute.xlu0 %169 }
 0x18d   :  { %v174_v36 = vmul.f32 %v170_v35, %v164_v34 }
 0x18f   :  { %346 = vmatmul.mubr.msk.f32.vlgmr.msra.gmra.mrb[0].mxu1 %vm185_vm1, %v174_v36 }
 0x262   :  { %v347_v39 = vpop.f32.mrb[0].mxu1 }
 0x263   :  { %v268_v40 = vadd.f32 %v347_v39, %v176_v37  ;;  %v258_v41 = vpop.f32.mrb[1].mxu1 }
 0x264   :  { %v267_v42 = vadd.f32 %v258_v41, %v175_v38 }
 0x265   :  { %270 = vst.msk [vmem:[#allocation2 + $0x8] sm:$0xff] %vm60_vm0, %v268_v40 }
 0x266   :  { %269 = vst.msk [vmem:[#allocation2] sm:$0xff] %vm60_vm0, %v267_v42 }
 0x26c   :  { %v275_v43 = vld [vmem:[#allocation2 + $0x8] sm:$0xff] }
 0x26d   :  { %v274_v44 = vld [vmem:[#allocation2] sm:$0xff]  ;;  %277 = vst.msk [vmem:[#allocation9 + $0x8] sm:$0xff] %vm60_vm0, %v275_v43 }
 0x26e   :  { %276 = vst.msk [vmem:[#allocation9] sm:$0xff] %vm60_vm0, %v274_v44 }
 0x26f   :  { %465 = shalt.err (!%p462_p0)
}
 0x270   :  { %s466_s28 = scalar_lea.hbm %s588_s3, 256 }
 0x271   :  { %p467_p1 = scmp.ne.s32.totalorder %s588_s3, %s466_s28  ;;  %p470_p2 = scmp.lt.u32.totalorder %s466_s28, %s588_s3 }
 0x273   :  { %p472_p3 = pnand %p470_p2, %p467_p1 }
 0x275   :  { %475 = shalt.err (!%p472_p3)
}
 0x276   :  { %289 = dma.vmem_to_hbm [thread:$0]  %s284_s22, 256, %s588_s3, [#allocation5], %s484_s24, %s484_s24, %s485_s25  }
 0x277   :  { %480 = dma.done.wait [#allocation5], 256  }
 0x278   :  { %481 = vsyncadd [#allocation5], 4294967040 }
 0x279   :  { %293 = vsyncpa [#allocation4], 1 }
 0x27a   :  { %294 = vsyncpa [#allocation7], 1 }
 0x27b   :  { %295 = vsyncpa [#allocation5], 1 }

</bundles_post_ra>
